<compile_context>
chip_gen: v7x
topology: tpu7x:2x2x1
jax: 0.10.0
libtpu: 0.0.40
codegen_flags: <defaults>
</compile_context>

<pallas_src>
import jax
import jax.numpy as jnp
from jax.experimental import pallas as pl
from jax.experimental.pallas import tpu as pltpu


def _cos_classifier_kernel(x_ref, w_ref, o_ref):
    # x_ref: (1, C, TN)  pixel tile (channels on sublanes, pixels on lanes)
    # w_ref: (K, C)      pre-normalized, pre-scaled class matrix (constant)
    # o_ref: (1, K, TN)  output tile of scaled cosine logits
    x = x_ref[0]                                               # (C, TN), input dtype

    # MXU matmul first: no dependency on the norm, so the systolic push
    # overlaps the XLU sublane-reduce / EUP sqrt below.
    s = jnp.dot(w_ref[...], x, preferred_element_type=jnp.float32)  # (K, TN) f32

    # Per-pixel (per-column) L2 norm over channels, f32 accumulation.
    xf = x.astype(jnp.float32)
    sumsq = jnp.sum(xf * xf, axis=0, keepdims=True)            # (1, TN)
    norm = jnp.sqrt(sumsq)
    # Exact reciprocal of the (1, TN) row (post-matmul placement makes this
    # cheap).  approx=True EUP reciprocal would relax accuracy below the
    # 1e-4 tolerance vs the torch eps=1e-10 semantics, so keep it exact.
    inv = 1.0 / (norm + jnp.float32(1e-10))                    # (1, TN)

    # Broadcast the per-column scale over the K rows; identical to
    # normalizing x before the matmul.
    o_ref[0] = (s * inv).astype(o_ref.dtype)


def _round_up(v, m):
    return (v + m - 1) // m * m


def _vmem_budget_and_limit():
    """Per-generation (block budget, compiler vmem limit) in bytes."""
    cap = None
    try:
        info = pltpu.get_tpu_info()
        cap = getattr(info, "vmem_capacity_bytes", None)
    except Exception:
        cap = None
    if not cap:
        cap = 128 * 1024 * 1024  # conservative v5e/v6e default
    # Blocks get ~1/4 of physical VMEM (32 MiB on v5e/v6e, 16 MiB on v7x),
    # compiler scoped limit at ~1/2 (64 MiB / 32 MiB) for headroom.
    budget = min(max(cap // 4, 8 * 1024 * 1024), 32 * 1024 * 1024)
    limit = min(cap // 2, 64 * 1024 * 1024)
    return budget, limit


def _choose_spatial_tile(hw, c, k, batch, vmem_budget_bytes, itemsize_in=4,
                         itemsize_out=4, min_steps=8):
    """Pick TN (multiple of 128, or the full spatial extent)."""
    c_pad = _round_up(max(c, 1), 8)   # f32 sublane padding of the channel dim
    k_pad = _round_up(max(k, 1), 8)   # f32 sublane padding of the class dim
    # Double-buffered input + output blocks, plus roughly one extra
    # input+output tile worth of in-kernel f32 temporaries (x*x, the matmul
    # result) as headroom.
    per_col = (2 * itemsize_in * c_pad          # input double buffer
               + 2 * itemsize_out * k_pad       # output double buffer
               + 4 * (c_pad + k_pad))           # f32 intermediates headroom
    # Constant (K, C) weight block (double-buffered, lane-padded to 128).
    weight_bytes = 2 * itemsize_in * k_pad * _round_up(max(c, 1), 128)
    avail = max(vmem_budget_bytes - weight_bytes, 128 * per_col)
    cap = max(128, (avail // per_col) // 128 * 128)
    tn = hw if hw <= cap else cap

    # Keep enough grid steps for megacore sharding / pipeline warm-up (mainly
    # v7x with 2 TCs); best effort — never go below a 128-lane tile.
    steps_needed = max(1, -(-min_steps // max(batch, 1)))
    if hw > 128 and -(-hw // tn) < steps_needed:
        tn_small = max(128, _round_up(-(-hw // steps_needed), 128))
        tn = min(tn, tn_small)
    return tn


def pixel_classifier_forward(x, weight, scale_factor=None, out_dtype=None):
    """x: (B, C, H, W); weight: (K, C, 1, 1) -> (B, K, H, W) scaled cosine logits."""
    if scale_factor is None:
        scale_factor = 10.0  # module default self.scale_factor
    B, C, H, W = x.shape
    K = weight.shape[0]
    HW = H * W
    if out_dtype is None:
        out_dtype = x.dtype   # default f32; pass jnp.bfloat16 to halve write bytes

    # Pre-normalize + pre-scale the class matrix in the wrapper (constant over
    # the grid).  Matches torch.norm(w, p=2, dim=1) with the same eps.
    w2d = weight.reshape(K, C).astype(jnp.float32)
    w_norm = jnp.sqrt(jnp.sum(w2d * w2d, axis=1, keepdims=True))
    w_pre = (jnp.float32(scale_factor) * (w2d / (w_norm + 1e-10))).astype(x.dtype)

    x3 = x.reshape(B, C, HW)  # free contiguous view; stays NCHW

    budget, vmem_limit = _vmem_budget_and_limit()
    tn = _choose_spatial_tile(
        HW, C, K, B, budget,
        itemsize_in=jnp.dtype(x.dtype).itemsize,
        itemsize_out=jnp.dtype(out_dtype).itemsize)
    grid = (B, pl.cdiv(HW, tn))

    out3 = pl.pallas_call(
        _cos_classifier_kernel,
        out_shape=jax.ShapeDtypeStruct((B, K, HW), out_dtype),
        grid_spec=pltpu.PrefetchScalarGridSpec(
            num_scalar_prefetch=0,
            grid=grid,
            in_specs=[
                pl.BlockSpec((1, C, tn), lambda b, j: (b, 0, j)),  # pixel tile
                pl.BlockSpec((K, C), lambda b, j: (0, 0)),         # constant weight
            ],
            out_specs=pl.BlockSpec((1, K, tn), lambda b, j: (b, 0, j)),
        ),
        compiler_params=pltpu.CompilerParams(
            dimension_semantics=("parallel", "parallel"),
            vmem_limit_bytes=int(vmem_limit)),
    )(x3, w_pre)

    return out3.reshape(B, K, H, W)


def _reference_forward(x, weight, scale_factor=10.0):
    """Pure-JAX reference mirroring the PyTorch module exactly."""
    x_norm = jnp.linalg.norm(x, axis=1, keepdims=True)
    x_n = x / (x_norm + 1e-10)
    w = weight  # (K, C, 1, 1)
    w_norm = jnp.linalg.norm(w, axis=1, keepdims=True)
    w_n = w / (w_norm + 1e-10)
    cos = jnp.einsum('bchw,kc->bkhw', x_n, w_n.reshape(w.shape[0], w.shape[1]))
    return scale_factor * cos


if __name__ == "__main__":
    key = jax.random.PRNGKey(0)
    k_x, k_w = jax.random.split(key)

    B, C, H, W = 2, 4, 16, 16        # (batch, in_channel, spatial, spatial)
    num_classes = 8

    x = jax.random.normal(k_x, (B, C, H, W), dtype=jnp.float32)
    # Deterministic stand-in for nn.Conv2d(in_channel, num_classes, 1, bias=False).weight
    weight = jax.random.normal(k_w, (num_classes, C, 1, 1), dtype=jnp.float32) * 0.1

    out = pixel_classifier_forward(x, weight)
    out = jax.block_until_ready(out)

    ref = _reference_forward(x, weight)
    assert out.shape == (B, num_classes, H, W)
    assert jnp.allclose(out, ref, atol=1e-4, rtol=1e-4), "mismatch vs reference"

    # TODO(synk): the PyTorch module mutates self.class_mat.weight.data in place
    # (persistent normalization side effect); the forward output here is identical
    # without replicating that statefulness.

    print("KERNEL_OK")
</pallas_src>

<mosaic_0001>
module attributes {stable_mosaic.version = 11 : i64} {
  func.func @_cos_classifier_kernel(%arg0: i32, %arg1: i32, %arg2: memref<1x4x128xf32, #tpu.memory_space<vmem>>, %arg3: memref<8x4xf32, #tpu.memory_space<vmem>>, %arg4: memref<1x8x128xf32, #tpu.memory_space<vmem>>) attributes {dimension_semantics = [#tpu.dimension_semantics<parallel>, #tpu.dimension_semantics<parallel>], iteration_bounds = array<i64: 2, 2>, scalar_prefetch = 0 : i64, scratch_operands = 0 : i64, tpu.core_type = #tpu.core_type<tc>, window_params = [{transform_indices = @transform_0, window_bounds = array<i64: 1, 4, 128>}, {pipeline_mode = #tpu.pipeline_mode<synchronous>, transform_indices = @transform_1, window_bounds = array<i64: 8, 4>}, {transform_indices = @transform_2, window_bounds = array<i64: 1, 8, 128>}]} {
    %c0 = arith.constant 0 : index
    %c0_0 = arith.constant 0 : index
    %c0_1 = arith.constant 0 : index
    %0 = vector.load %arg2[%c0, %c0_0, %c0_1] : memref<1x4x128xf32, #tpu.memory_space<vmem>>, vector<1x4x128xf32>
    %1 = vector.shape_cast %0 : vector<1x4x128xf32> to vector<4x128xf32>
    %c0_2 = arith.constant 0 : index
    %c0_3 = arith.constant 0 : index
    %2 = vector.load %arg3[%c0_2, %c0_3] : memref<8x4xf32, #tpu.memory_space<vmem>>, vector<8x4xf32>
    %cst = arith.constant dense<0.000000e+00> : vector<8x128xf32>
    %3 = tpu.matmul %2, %1, %cst {dimension_numbers = #tpu.dot_dimension_numbers<[1], [0], [0], [1], [0, 0, 1, 1], [], []>} : vector<8x4xf32>, vector<4x128xf32>, vector<8x128xf32> -> vector<8x128xf32>
    %4 = arith.mulf %1, %1 : vector<4x128xf32>
    %cst_4 = arith.constant dense<0.000000e+00> : vector<128xf32>
    %5 = vector.multi_reduction <add>, %4, %cst_4 [0] : vector<4x128xf32> to vector<128xf32>
    %6 = vector.shape_cast %5 : vector<128xf32> to vector<1x128xf32>
    %7 = math.sqrt %6 : vector<1x128xf32>
    %cst_5 = arith.constant 1.000000e-10 : f32
    %8 = vector.broadcast %cst_5 : f32 to vector<1x128xf32>
    %9 = arith.addf %7, %8 : vector<1x128xf32>
    %cst_6 = arith.constant 1.000000e+00 : f32
    %10 = vector.broadcast %cst_6 : f32 to vector<1x128xf32>
    %11 = arith.divf %10, %9 : vector<1x128xf32>
    %12 = vector.broadcast %11 : vector<1x128xf32> to vector<8x128xf32>
    %13 = arith.mulf %3, %12 : vector<8x128xf32>
    %c0_7 = arith.constant 0 : index
    %c0_8 = arith.constant 0 : index
    %c0_9 = arith.constant 0 : index
    %14 = vector.load %arg4[%c0_7, %c0_8, %c0_9] : memref<1x8x128xf32, #tpu.memory_space<vmem>>, vector<1x8x128xf32>
    %15 = vector.shape_cast %14 : vector<1x8x128xf32> to vector<8x128xf32>
    %16 = vector.shape_cast %13 : vector<8x128xf32> to vector<1x8x128xf32>
    tpu.vector_store %arg4[%c0_7, %c0_8, %c0_9], %16 {strides = array<i32>} : memref<1x8x128xf32, #tpu.memory_space<vmem>>, vector<1x8x128xf32>,
    return
  }
  func.func @transform_0(%arg0: i32, %arg1: i32) -> (i32, i32, i32) {
    %c0_i32 = arith.constant 0 : i32
    %c0_i32_0 = arith.constant 0 : i32
    return %arg0, %c0_i32, %arg1 : i32, i32, i32
  }
  func.func @transform_1(%arg0: i32, %arg1: i32) -> (i32, i32) {
    %c0_i32 = arith.constant 0 : i32
    %c0_i32_0 = arith.constant 0 : i32
    %c0_i32_1 = arith.constant 0 : i32
    return %c0_i32, %c0_i32_0 : i32, i32
  }
  func.func @transform_2(%arg0: i32, %arg1: i32) -> (i32, i32, i32) {
    %c0_i32 = arith.constant 0 : i32
    %c0_i32_0 = arith.constant 0 : i32
    return %arg0, %c0_i32, %arg1 : i32, i32, i32
  }
}

</mosaic_0001>

<bundles_post_ra>
// kernel: tpu_custom_call.1
= control target key start
LH: loop header
LB: loop body
LE: loop exit
PB: predicated region body
PF: predicated region fallthrough
CT: control target
= control target key end

     0   :  { %s943_s0 = inlined_call_operand.hbm [shape: f32[2,4,256], index: 0, kind: input, shape index: {}]   ;;  %s944_s1 = inlined_call_operand.hbm [shape: f32[8,4], index: 1, kind: input, shape index: {}]   ;;  %s945_s2 = inlined_call_operand.hbm [shape: f32[2,8,256], index: 2, kind: output, shape index: {}]  }
   0x1   :  { %952 = sst [smem:[#allocation13_spill]] %s944_s1 }
   0x2   :  { %7 = vsyncpa [#allocation3], 0 }
   0x3   :  { %9 = vsyncpa [#allocation3 + $0x1], 0 }
   0x4   :  { %10 = vsyncpa [#allocation6], 0 }
   0x5   :  { %11 = vsyncpa [#allocation4], 0 }
   0x6   :  { %13 = vsyncpa [#allocation4 + $0x1], 0  ;;  %s704_s9 = smov 0   ;;  %s706_s10 = smov 0  }
   0x7   :  { %s708_s11 = smov 0   ;;  %s710_s12 = smov 0  }
   0x8   :  { %s712_s13 = smov 0   ;;  %s714_s14 = smov 0  }
   0x9   :  { %s716_s15 = smov 0   ;;  %s718_s16 = smov 0  }
   0xa LB: > { %s401_s17 = sadd.s32 4294967295, %s682_s16   ;;  %s402_s18 = sadd.s32 4294967294, %s682_s16   ;;  %s682_s16 = sphi %s718_s16, %s19_s16   ;;  %s678_s15 = sphi %s716_s15, %s978_s15   ;;  %s674_s14 = sphi %s714_s14, %s977_s14   ;;  %s670_s13 = sphi %s712_s13, %s976_s13   ;;  %s666_s12 = sphi %s710_s12, %s975_s12   ;;  %s662_s11 = sphi %s708_s11, %s974_s11   ;;  %s658_s10 = sphi %s706_s10, %s973_s10   ;;  %s654_s9 = sphi %s704_s9, %s972_s9  }
   0xb   : > { %p53_p0 = scmp.ne.s32.totalorder %s658_s10, %s654_s9  ;;  %p748_p1 = scmp.eq.s32.totalorder %s401_s17, 0 }
   0xc   : > { %p752_p2 = scmp.eq.s32.totalorder %s401_s17, 3  ;;  %p106_p3 = scmp.eq.s32.totalorder %s402_s18, 3 }
   0xd   : > { %s953_s19 = scalar_select %p748_p1, 1, 0 }
   0xe   : > { %s954_s20 = scalar_select %p752_p2, 1, 0 }
   0xf   : > { %p758_p4 = por %p748_p1, %p53_p0  ;;  %p403_p5 = scmp.ge.s32.totalorder %s682_s16, 1 }
  0x10   : > { %p763_p6 = por %p106_p3, %p53_p0  ;;  %p113_p7 = scmp.lt.s32.totalorder %s682_s16, 5 }
  0x11   : > { %s955_s21 = scalar_select %p758_p4, 1, 0 }
  0x12   : > { %s956_s22 = scalar_select %p763_p6, 1, 0 }
  0x13   : > { %p768_p8 = pnand %p403_p5, %p113_p7  ;;  %s684_s24 = smov [#allocation5]  }
  0x14   : > { %957 = sst [smem:[#allocation11_spill]] %s956_s22  ;;  %s126_s25 = sshll.u32 %s684_s24, 4  ;;  %s127_s25 = int_to_ptr.vmem [resolvable:$true] %s126_s25 }
  0x15   : > { %s958_s23 = scalar_select %p768_p8, 1, 0 }
  0x16   : > { %p435_p9 = pneg %p768_p8  ;;  %s28_s27 = sadd.s32 1, %s674_s14 }
  0x17   : > { %s960_s1 = sld [smem:[#allocation13_spill]] }
  0x18   : > { %p776_p10 = pnand %p435_p9, %p748_p1 }
  0x1a   : > { %p524_p12 = pneg %p776_p10 }
  0x1d   : > { %s522_s30 = scalar_lea.hbm %s960_s1, 128 }
  0x1e   : > { %p523_p11 = scmp.ne.s32.totalorder %s960_s1, %s522_s30  ;;  %p529_p3 = scmp.lt.u32.totalorder %s522_s30, %s960_s1 }
  0x20   : > { %p525_p13 = pnand %p524_p12, %p523_p11 }
  0x22   : > { %p526_p0 = pneg %p525_p13 }
  0x24   : > { %p531_p5 = pnand %p529_p3, %p526_p0 }
  0x26   : > { %534 = shalt.err (!%p531_p5)
}
  0x27   : > { %s535_s7 = scalar_lea.vmem %s127_s25, 128  ;;  %p543_p1 = scmp.lt.s32.totalorder %s127_s25, %s127_s25 }
  0x28   : > { %p536_p7 = scmp.ne.s32.totalorder %s127_s25, %s535_s7  ;;  %p544_p4 = scmp.lt.s32.totalorder %s535_s7, %s535_s7 }
  0x2a   : > { %p538_p9 = pnand %p536_p7, %p524_p12  ;;  %p545_p8 = por %p544_p4, %p543_p1 }
  0x2c   : > { %p539_p6 = pneg %p538_p9 }
  0x2e   : > { %p546_p2 = pnand %p545_p8, %p539_p6 }
  0x30   : > { %549 = shalt.err (!%p546_p2)
}
  0x31   : > { %438 = dma.hbm_to_vmem [thread:$0]  (!%p776_p10), %s960_s1, 128, %s127_s25, [#allocation6]  }
  0x32   : > { %p29_p1 = scmp.ge.s32.totalorder %s28_s27, 2  ;;  %s31_s18 = sadd.s32 1, %s678_s15 }
  0x33   : > { %s40_s24 = sadd.s32 1, %s662_s11  ;;  %p47_p2 = scmp.ne.s32.totalorder %s662_s11, %s658_s10 }
  0x34   : > { %s980_s27 = smov (%p29_p1, %s28_s27), 0  ;;  %s982_s18 = smov (!%p29_p1, %s31_s18), %s678_s15 }
  0x35   : > { %961 = sst [smem:[#allocation12_spill]] %s980_s27  ;;  %s36_s26 = ssub.s32 %s674_s14, %s980_s27 }
  0x36   : > { %p48_p4 = scmp.eq.s32.totalorder %s682_s16, 0  ;;  %p33_p6 = scmp.ge.s32.totalorder %s982_s18, 2 }
  0x37   : > { %p962_p8 = scmp.ne.s32.totalorder %s954_s20, 0  ;;  %p448_p12 = scmp.lt.s32.totalorder %s682_s16, 4 }
  0x38   : > { %p813_p10 = por %p48_p4, %p47_p2  ;;  %s984_s18 = smov (%p33_p6, %s982_s18), 0 }
  0x39   : > { %p809_p11 = por %p962_p8, %p47_p2  ;;  %s137_s29 = sand.u32 1, %s662_s11  }
  0x3a   : > { %s407_s30 = sshll.u32 %s678_s15, 1  ;;  %s35_s3 = ssub.s32 %s678_s15, %s984_s18 }
  0x3b   : > { %s37_s4 = sor.u32 %s36_s26, %s35_s3  ;;  %s406_s5 = sshll.u32 %s137_s29, 2 }
  0x3c   : > { %p38_p13 = scmp.eq.s32.totalorder %s37_s4, 0  ;;  %s146_s20 = sadd.s32 %s674_s14, %s407_s30 }
  0x3d   : > { %s141_s6 = scalar_lea.vmem [#allocation2], %s406_s5  ;;  %s408_s17 = sshll.u32 %s146_s20, 6 }
  0x3e   : > { %s150_s7 = sshll.u32 %s141_s6, 4  ;;  %s833_s22 = scalar_lea.hbm %s943_s0, %s408_s17  ;;  %s828_s7 = int_to_ptr.vmem [resolvable:$true] %s150_s7 }
  0x3f   : > { %s826_s8 = scalar_select %p38_p13, %s662_s11, %s40_s24  }
  0x40   : > { %p839_p0 = pnand %p448_p12, %p813_p10  ;;  %s138_s24 = scalar_lea.sflag [#allocation3], %s137_s29 }
  0x41   : > { %s550_s30 = scalar_lea.hbm %s833_s22, 64  ;;  %s555_s25 = scalar_lea.hbm %s943_s0, 256 }
  0x42   : > { %p551_p3 = scmp.ne.s32.totalorder %s833_s22, %s550_s30  ;;  %p552_p5 = pneg %p839_p0 }
  0x43   : > { %p556_p1 = scmp.lt.u32.totalorder %s833_s22, %s943_s0  ;;  %p557_p2 = scmp.lt.u32.totalorder %s555_s25, %s550_s30 }
  0x44   : > { %p553_p7 = pnand %p552_p5, %p551_p3  ;;  %p559_p6 = scmp.lt.u32.totalorder %s550_s30, %s833_s22 }
  0x45   : > { %p558_p4 = por %p557_p2, %p556_p1 }
  0x46   : > { %p554_p9 = pneg %p553_p7 }
  0x47   : > { %p560_p8 = por %p559_p6, %p558_p4 }
  0x49   : > { %p561_p10 = pnand %p560_p8, %p554_p9 }
  0x4b   : > { %564 = shalt.err (!%p561_p10)
}
  0x4c   : > { %s565_s29 = scalar_lea.vmem %s828_s7, 64  ;;  %s685_s5 = smov [#allocation2]  }
  0x4d   : > { %p566_p12 = scmp.ne.s32.totalorder %s828_s7, %s565_s29  ;;  %s570_s20 = sshll.u32 %s685_s5, 4  ;;  %s571_s20 = int_to_ptr.vmem [resolvable:$false] %s570_s20 }
  0x4e   : > { %s572_s6 = scalar_lea.vmem %s571_s20, 128  ;;  %p573_p7 = scmp.lt.s32.totalorder %s828_s7, %s571_s20 }
  0x4f   : > { %p568_p13 = pnand %p566_p12, %p552_p5  ;;  %p574_p1 = scmp.lt.s32.totalorder %s572_s6, %s565_s29 }
  0x51   : > { %p569_p3 = pneg %p568_p13  ;;  %p575_p2 = por %p574_p1, %p573_p7 }
  0x53   : > { %p576_p4 = pnand %p575_p2, %p569_p3 }
  0x55   : > { %579 = shalt.err (!%p576_p4)
}
  0x56   : > { %442 = dma.hbm_to_vmem [thread:$0]  (!%p839_p0), %s833_s22, 64, %s828_s7, %s138_s24  }
  0x57   : > { %p966_p9 = scmp.ne.s32.totalorder %s958_s23, 0 }
  0x58   : > { %s871_s17 = sand.u32 (!%p966_p9), 1, %s658_s10   ;;  %p967_p5 = scmp.ne.s32.totalorder (!%p966_p9), %s955_s21, 0 }
  0x59   : > { %159 = sbr.rel (%p966_p9) target bundleno = 331 (0x14b), region = 28  ;;  %s410_s30 = sshll.u32 (!%p966_p9), %s871_s17, 2 }
  0x5a   : > { %s162_s1 = scalar_lea.sflag (!%p966_p9), [#allocation3], %s871_s17  ;;  %s165_s27 = scalar_lea.vmem (!%p966_p9), [#allocation2], %s410_s30 }
  0x60   : > { %641 = dma.done.wait (%p967_p5), %s162_s1, 64  }
  0x61   : > { %643 = vsyncadd (%p967_p5), %s162_s1, 4294967232  ;;  %p968_p6 = scmp.ne.s32.totalorder %s953_s19, 0 }
  0x63   : > { %645 = dma.done.wait (%p968_p6), [#allocation6], 128  }
  0x64   : > { %647 = vsyncadd (%p968_p6), [#allocation6], 4294967168  ;;  %v686_v0 = vmov 0.0   ;;  %vm687_vm0 = vmmov 0   ;;  %vm196_vm1 = vcmask 1043456   ;;  %vm192_vm2 = vcmask 31744  }
  0x65   : > { %422 = vmatprep.subr.mxu0 %v686_v0  ;;  %424 = vmatprep.mubr.msk.f32.mxu0 %vm687_vm0, %v686_v0  ;;  %v190_v1 = vld [vmem:[%s165_s27] sm:$0xf]  ;;  %v191_v2 = vld [vmem:[#allocation5] sm:$0xff]  ;;  %s412_s19 = sshll.u32 %s871_s17, 3  ;;  %s416_s21 = sshll.u32 %s670_s13, 1 }
  0x66   : > { %423 = vmatpush3.msk.msra.mxu0 %vm196_vm1, %v190_v1  ;;  %v270_v3 = vmul.f32 %v190_v1, %v190_v1  ;;  %s302_s22 = sadd.s32 %s666_s12, %s416_s21  ;;  %s189_s7 = scalar_lea.vmem [#allocation7], %s412_s19 }
  0x67   : > { %425 = vmatmul.mubr.msk.f32.vlgmr.msra.gmra.mrb[0].mxu0 %vm192_vm2, %v191_v2  ;;  %s417_s23 = sshll.u32 %s302_s22, 7  ;;  %s306_s26 = sshll.u32 %s189_s7, 4  ;;  %s891_s26 = int_to_ptr.vmem [resolvable:$true] %s306_s26 }
  0x68   : > { %v271_v4 = vsel %vm196_vm1, %v270_v3, 0.0  ;;  %s889_s3 = scalar_lea.hbm %s945_s2, %s417_s23  ;;  %s291_s13 = scalar_lea.sflag [#allocation4], %s871_s17 }
  0x69   : > { %v272_v5 = vrot.slane %v271_v4, 4  ;;  %s580_s12 = scalar_lea.vmem %s891_s26, 128  ;;  %s688_s4 = smov [#allocation7]  }
  0x6a   : > { %p581_p0 = scmp.ne.s32.totalorder %s891_s26, %s580_s12  ;;  %s584_s29 = sshll.u32 %s688_s4, 4  ;;  %s585_s29 = int_to_ptr.vmem [resolvable:$false] %s584_s29 }
  0x6b   : > { %v273_v6 = vadd.f32 %v272_v5, %v271_v4  ;;  %s586_s5 = scalar_lea.vmem %s585_s29, 256  ;;  %p587_p12 = scmp.lt.s32.totalorder %s891_s26, %s585_s29 }
  0x6c   : > { %p582_p8 = pnand %p581_p0, %p809_p11  ;;  %p588_p13 = scmp.lt.s32.totalorder %s586_s5, %s580_s12 }
  0x6d   : > { %v274_v7 = vrot.slane %v273_v6, 2 }
  0x6e   : > { %p583_p10 = pneg %p582_p8  ;;  %p589_p3 = por %p588_p13, %p587_p12 }
  0x6f   : > { %v275_v8 = vadd.f32 %v274_v7, %v273_v6 }
  0x70   : > { %p590_p7 = pnand %p589_p3, %p583_p10 }
  0x71   : > { %v276_v9 = vrot.slane %v275_v8, 1 }
  0x73   : > { %v277_v10 = vadd.f32 %v276_v9, %v275_v8 }
  0x75   : > { %518 = vrsqrt.f32 %v277_v10  ;;  %vm280_vm3 = vcmp.eq.f32.partialorder %v277_v10, inf  ;;  %v283_v13 = vand.u32 2147483648, %v277_v10  ;;  %vm282_vm4 = vcmp.eq.f32.partialorder %v277_v10, 0.0 }
  0x7f   : > { %v519_v11 = vpop.eup %518 }
  0x80   : > { %v279_v12 = vmul.f32 %v519_v11, %v277_v10 }
  0x82   : > { %v281_v14 = vsel %vm280_vm3, %v277_v10, %v279_v12 }
  0x83   : > { %v284_v15 = vsel %vm282_vm4, %v283_v13, %v281_v14 }
  0x84   : > { %v285_v16 = vadd.f32 1e-10, %v284_v15 }
  0x86   : > { %520 = vrcp.f32 %v285_v16 }
  0x90   : > { %v521_v17 = vpop.eup %520 }
 0x13a   : > { %v266_v18 = vpop.f32.mrb[0].mxu0 }
 0x13b   : > { %v288_v19 = vmul.f32 %v521_v17, %v266_v18  ;;  %v426_v20 = vpop.f32.mrb[1].mxu0 }
 0x13d   : > { %289 = vst [vmem:[%s189_s7] sm:$0xff] %v288_v19 }
 0x13e   : > { %593 = shalt.err (!%p590_p7)
}
 0x13f   : > { %s594_s20 = scalar_lea.hbm %s889_s3, 128  ;;  %s598_s30 = scalar_lea.hbm %s945_s2, 512 }
 0x140   : > { %p595_p1 = scmp.ne.s32.totalorder %s889_s3, %s594_s20  ;;  %p599_p9 = scmp.lt.u32.totalorder %s889_s3, %s945_s2 }
 0x141   : > { %p600_p5 = scmp.lt.u32.totalorder %s598_s30, %s594_s20  ;;  %p602_p0 = scmp.lt.u32.totalorder %s594_s20, %s889_s3 }
 0x142   : > { %p596_p2 = pnand %p595_p1, %p809_p11 }
 0x143   : > { %p601_p6 = por %p600_p5, %p599_p9 }
 0x144   : > { %p597_p4 = pneg %p596_p2 }
 0x145   : > { %p603_p8 = por %p602_p0, %p601_p6 }
 0x147   : > { %p604_p10 = pnand %p603_p8, %p597_p4 }
 0x149   : > { %607 = shalt.err (!%p604_p10)
}
 0x14a   : > { %433 = dma.vmem_to_hbm [thread:$0]  (%p809_p11), %s891_s26, 128, %s889_s3, %s291_s13  }
 0x14b PF: > { %s969_s19 = sld [smem:[#allocation11_spill]]  ;;  %p450_p12 = scmp.ge.s32.totalorder %s682_s16, 2 }
 0x14c   : > { %s318_s21 = sand.u32 1, %s654_s9  }
 0x14d   : > { %s319_s22 = scalar_lea.sflag [#allocation4], %s318_s21 }
 0x151   : > { %p970_p13 = scmp.ne.s32.totalorder %s969_s19, 0 }
 0x153   : > { %p444_p3 = pnand %p450_p12, %p970_p13 }
 0x155   : > { %649 = dma.done.wait (!%p444_p3), %s319_s22, 128  }
 0x156   : > { %651 = vsyncadd (!%p444_p3), %s319_s22, 4294967168  ;;  %s19_s16 = sadd.s32 1, %s682_s16   ;;  %s971_s28 = sld [smem:[#allocation12_spill]] }
 0x157   : > { %p16_p7 = scmp.ge.s32.totalorder %s19_s16, 6   ;;  %s972_s9 = smov %s658_s10 }
 0x158   : > { %s973_s10 = smov %s662_s11  ;;  %s974_s11 = smov %s826_s8 }
 0x159   : > { %s975_s12 = smov %s674_s14  ;;  %s976_s13 = smov %s678_s15 }
 0x15a   : > { %s978_s15 = smov %s984_s18  ;;  %18 = sbr.rel (!%p16_p7) target bundleno = 10 (0xa), region = 77 }
 0x15c   : > { %s977_s14 = smov %s971_s28 }
 0x161   :  { %324 = vsyncpa [#allocation3], 1 }
 0x162   :  { %326 = vsyncpa [#allocation3 + $0x1], 1 }
 0x163   :  { %327 = vsyncpa [#allocation6], 1 }
 0x164   :  { %328 = vsyncpa [#allocation4], 1 }
 0x165   :  { %330 = vsyncpa [#allocation4 + $0x1], 1 }

</bundles_post_ra>
